<compile_context>
chip_gen: v7x
topology: tpu7x:2x2x1
jax: 0.10.0
libtpu: 0.0.40
codegen_flags: <defaults>
</compile_context>

<pallas_src>
import jax
import jax.numpy as jnp
from jax.experimental import pallas as pl
from jax.experimental.pallas import tpu as pltpu

LANES = 128
SUBLANES = 8
GROUP = SUBLANES * LANES            # 1024 elements per (8, 128) group
MAX_GROUPS_PER_BLOCK = 256          # 256 groups = 2048 x 128 = 1 MiB f32 / input block


def _make_kernel(r8, bpc, nb, m8, needs_mask):
    def kernel(x_ref, t_ref, o_ref):
        c = pl.program_id(0)        # core-split axis ("parallel")
        i = pl.program_id(1)        # reduction axis ("arbitrary")

        @pl.when(i == 0)
        def _init():
            o_ref[...] = jnp.zeros_like(o_ref)

        x = x_ref[...].astype(jnp.float32)    # (r8, 8, 128)
        t = t_ref[...].astype(jnp.float32)

        if needs_mask:
            # Zero out groups past the end of the data, including fully
            # out-of-range duplicate blocks created by index clamping.
            blk = c * bpc + i
            g = jax.lax.broadcasted_iota(jnp.int32, (r8, SUBLANES, LANES), 0) + blk * r8
            ok = g < m8
            x = jnp.where(ok, x, 0.0)
            t = jnp.where(ok, t, 0.0)

        # Vector accumulation into the VMEM-resident output block (pure VPU
        # adds in steady state); scalar reduce is deferred to the wrapper.
        o_ref[0, 0, :, :] += jnp.sum(x * t, axis=0)   # sum(x * t)
        o_ref[0, 1, :, :] += jnp.sum(x, axis=0)       # sum(x)
        o_ref[0, 2, :, :] += jnp.sum(t, axis=0)       # sum(t)

    return kernel


def _tversky_sums(x_flat, t_flat):
    """Returns (sum(x*t), sum(x), sum(t)) as f32 scalars via a Pallas kernel."""
    n = x_flat.shape[0]
    n_pad = pl.cdiv(n, GROUP) * GROUP
    if n_pad != n:
        # Only the ragged < 1024-element tail is padded; zeros add 0 to all sums.
        x_flat = jnp.pad(x_flat, (0, n_pad - n))
        t_flat = jnp.pad(t_flat, (0, n_pad - n))
    m8 = n_pad // GROUP
    x3 = x_flat.reshape(m8, SUBLANES, LANES)
    t3 = t_flat.reshape(m8, SUBLANES, LANES)

    r8 = min(MAX_GROUPS_PER_BLOCK, m8)       # (8,128)-groups per block
    nb = pl.cdiv(m8, r8)                     # number of row blocks
    n_cores = 2 if nb >= 2 else 1            # use both TCs on v7x when enough work
    bpc = pl.cdiv(nb, n_cores)               # blocks per core
    needs_mask = (nb * r8 != m8) or (n_cores * bpc != nb)

    def in_map(c, i):
        # Clamp so duplicated trailing blocks stay in bounds; the in-kernel
        # mask zeroes their contribution.
        return (jnp.minimum(c * bpc + i, nb - 1), 0, 0)

    partials = pl.pallas_call(
        _make_kernel(r8, bpc, nb, m8, needs_mask),
        out_shape=jax.ShapeDtypeStruct((n_cores, 3, SUBLANES, LANES), jnp.float32),
        grid_spec=pltpu.PrefetchScalarGridSpec(
            num_scalar_prefetch=0,
            grid=(n_cores, bpc),
            in_specs=[
                pl.BlockSpec((r8, SUBLANES, LANES), in_map),
                pl.BlockSpec((r8, SUBLANES, LANES), in_map),
            ],
            out_specs=pl.BlockSpec((1, 3, SUBLANES, LANES), lambda c, i: (c, 0, 0, 0)),
        ),
        compiler_params=pltpu.CompilerParams(
            dimension_semantics=("parallel", "arbitrary"),
        ),
    )(x3, t3)

    sums = jnp.sum(partials, axis=(0, 2, 3))   # (3,) = [S_xt, S_x, S_t]
    return sums[0], sums[1], sums[2]


@jax.jit
def _tversky_loss_impl(inputs, targets, smooth):
    alpha = jnp.float32(0.4)
    beta = jnp.float32(1.0) - alpha
    x = jnp.reshape(inputs, (-1,))
    t = jnp.reshape(targets, (-1,))
    s_xt, s_x, s_t = _tversky_sums(x, t)
    tp = s_xt
    fp = s_x - s_xt            # == sum((1 - t) * x)
    fn = s_t - s_xt            # == sum(t * (1 - x))
    tversky = (tp + smooth) / (tp + alpha * fp + beta * fn + smooth)
    return jnp.float32(1.0) - tversky


def tversky_loss(inputs, targets, smooth=1.0):
    return _tversky_loss_impl(inputs, targets, jnp.float32(smooth))


def tversky_loss_ref(inputs, targets, smooth=1.0):
    alpha = 0.4
    beta = 1.0 - alpha
    x = jnp.reshape(inputs, (-1,)).astype(jnp.float32)
    t = jnp.reshape(targets, (-1,)).astype(jnp.float32)
    tp = jnp.sum(x * t)
    fp = jnp.sum((1.0 - t) * x)
    fn = jnp.sum(t * (1.0 - x))
    tversky = (tp + smooth) / (tp + alpha * fp + beta * fn + smooth)
    return 1.0 - tversky


if __name__ == "__main__":
    key = jax.random.PRNGKey(0)
    k1, k2, k3, k4 = jax.random.split(key, 4)

    # Typical UNet segmentation output shapes: (N, C, H, W).
    inputs = jax.random.uniform(k1, (2, 4, 16, 16), dtype=jnp.float32)
    targets = (jax.random.uniform(k2, (2, 4, 16, 16)) > 0.5).astype(jnp.float32)
    loss = jax.block_until_ready(tversky_loss(inputs, targets))
    ref = tversky_loss_ref(inputs, targets)
    assert jnp.allclose(loss, ref, atol=1e-5, rtol=1e-5), (loss, ref)

    # Non-divisible shape: exercises the tail pad, the in-kernel mask and the
    # 2-way core-split grid.
    inputs2 = jax.random.uniform(k3, (2, 4, 183, 183), dtype=jnp.float32)
    targets2 = (jax.random.uniform(k4, (2, 4, 183, 183)) > 0.5).astype(jnp.float32)
    loss2 = jax.block_until_ready(tversky_loss(inputs2, targets2))
    ref2 = tversky_loss_ref(inputs2, targets2)
    assert jnp.allclose(loss2, ref2, atol=1e-4, rtol=1e-4), (loss2, ref2)

    print("KERNEL_OK")
</pallas_src>

<mosaic_0001>
module attributes {stable_mosaic.version = 11 : i64} {
  func.func @kernel(%arg0: i32, %arg1: i32, %arg2: memref<2x8x128xf32, #tpu.memory_space<vmem>>, %arg3: memref<2x8x128xf32, #tpu.memory_space<vmem>>, %arg4: memref<1x3x8x128xf32, #tpu.memory_space<vmem>>) attributes {dimension_semantics = [#tpu.dimension_semantics<parallel>, #tpu.dimension_semantics<arbitrary>], iteration_bounds = array<i64: 1, 1>, scalar_prefetch = 0 : i64, scratch_operands = 0 : i64, tpu.core_type = #tpu.core_type<tc>, window_params = [{transform_indices = @transform_0, window_bounds = array<i64: 2, 8, 128>}, {transform_indices = @transform_1, window_bounds = array<i64: 2, 8, 128>}, {transform_indices = @transform_2, window_bounds = array<i64: 1, 3, 8, 128>}]} {
    %c0_i32 = arith.constant 0 : i32
    %0 = arith.cmpi eq, %arg1, %c0_i32 : i32
    %1 = arith.extui %0 : i1 to i32
    %c0_i32_0 = arith.constant 0 : i32
    %2 = arith.cmpi ne, %1, %c0_i32_0 : i32
    scf.if %2 {
      %cst_30 = arith.constant 0.000000e+00 : f32
      %27 = vector.broadcast %cst_30 : f32 to vector<1x3x8x128xf32>
      %c0_31 = arith.constant 0 : index
      %c0_32 = arith.constant 0 : index
      %c0_33 = arith.constant 0 : index
      %c0_34 = arith.constant 0 : index
      %28 = vector.load %arg4[%c0_31, %c0_32, %c0_33, %c0_34] : memref<1x3x8x128xf32, #tpu.memory_space<vmem>>, vector<1x3x8x128xf32>
      tpu.vector_store %arg4[%c0_31, %c0_32, %c0_33, %c0_34], %27 {strides = array<i32>} : memref<1x3x8x128xf32, #tpu.memory_space<vmem>>, vector<1x3x8x128xf32>,
    } else {
    }
    %c0 = arith.constant 0 : index
    %c0_1 = arith.constant 0 : index
    %c0_2 = arith.constant 0 : index
    %3 = vector.load %arg2[%c0, %c0_1, %c0_2] : memref<2x8x128xf32, #tpu.memory_space<vmem>>, vector<2x8x128xf32>
    %c0_3 = arith.constant 0 : index
    %c0_4 = arith.constant 0 : index
    %c0_5 = arith.constant 0 : index
    %4 = vector.load %arg3[%c0_3, %c0_4, %c0_5] : memref<2x8x128xf32, #tpu.memory_space<vmem>>, vector<2x8x128xf32>
    %c0_6 = arith.constant 0 : index
    %c0_7 = arith.constant 0 : index
    %c0_8 = arith.constant 0 : index
    %c0_9 = arith.constant 0 : index
    %5 = vector.load %arg4[%c0_6, %c0_7, %c0_8, %c0_9] : memref<1x3x8x128xf32, #tpu.memory_space<vmem>>, vector<1x1x8x128xf32>
    %6 = vector.shape_cast %5 : vector<1x1x8x128xf32> to vector<8x128xf32>
    %7 = arith.mulf %3, %4 : vector<2x8x128xf32>
    %cst = arith.constant dense<0.000000e+00> : vector<8x128xf32>
    %8 = vector.multi_reduction <add>, %7, %cst [0] : vector<2x8x128xf32> to vector<8x128xf32>
    %9 = arith.addf %6, %8 : vector<8x128xf32>
    %c0_10 = arith.constant 0 : index
    %c0_11 = arith.constant 0 : index
    %c0_12 = arith.constant 0 : index
    %c0_13 = arith.constant 0 : index
    %10 = vector.load %arg4[%c0_10, %c0_11, %c0_12, %c0_13] : memref<1x3x8x128xf32, #tpu.memory_space<vmem>>, vector<1x1x8x128xf32>
    %11 = vector.shape_cast %10 : vector<1x1x8x128xf32> to vector<8x128xf32>
    %12 = vector.shape_cast %9 : vector<8x128xf32> to vector<1x1x8x128xf32>
    tpu.vector_store %arg4[%c0_10, %c0_11, %c0_12, %c0_13], %12 {strides = array<i32>} : memref<1x3x8x128xf32, #tpu.memory_space<vmem>>, vector<1x1x8x128xf32>,
    %c0_14 = arith.constant 0 : index
    %c1 = arith.constant 1 : index
    %c0_15 = arith.constant 0 : index
    %c0_16 = arith.constant 0 : index
    %13 = vector.load %arg4[%c0_14, %c1, %c0_15, %c0_16] : memref<1x3x8x128xf32, #tpu.memory_space<vmem>>, vector<1x1x8x128xf32>
    %14 = vector.shape_cast %13 : vector<1x1x8x128xf32> to vector<8x128xf32>
    %cst_17 = arith.constant dense<0.000000e+00> : vector<8x128xf32>
    %15 = vector.multi_reduction <add>, %3, %cst_17 [0] : vector<2x8x128xf32> to vector<8x128xf32>
    %16 = arith.addf %14, %15 : vector<8x128xf32>
    %c0_18 = arith.constant 0 : index
    %c1_19 = arith.constant 1 : index
    %c0_20 = arith.constant 0 : index
    %c0_21 = arith.constant 0 : index
    %17 = vector.load %arg4[%c0_18, %c1_19, %c0_20, %c0_21] : memref<1x3x8x128xf32, #tpu.memory_space<vmem>>, vector<1x1x8x128xf32>
    %18 = vector.shape_cast %17 : vector<1x1x8x128xf32> to vector<8x128xf32>
    %19 = vector.shape_cast %16 : vector<8x128xf32> to vector<1x1x8x128xf32>
    tpu.vector_store %arg4[%c0_18, %c1_19, %c0_20, %c0_21], %19 {strides = array<i32>} : memref<1x3x8x128xf32, #tpu.memory_space<vmem>>, vector<1x1x8x128xf32>,
    %c0_22 = arith.constant 0 : index
    %c2 = arith.constant 2 : index
    %c0_23 = arith.constant 0 : index
    %c0_24 = arith.constant 0 : index
    %20 = vector.load %arg4[%c0_22, %c2, %c0_23, %c0_24] : memref<1x3x8x128xf32, #tpu.memory_space<vmem>>, vector<1x1x8x128xf32>
    %21 = vector.shape_cast %20 : vector<1x1x8x128xf32> to vector<8x128xf32>
    %cst_25 = arith.constant dense<0.000000e+00> : vector<8x128xf32>
    %22 = vector.multi_reduction <add>, %4, %cst_25 [0] : vector<2x8x128xf32> to vector<8x128xf32>
    %23 = arith.addf %21, %22 : vector<8x128xf32>
    %c0_26 = arith.constant 0 : index
    %c2_27 = arith.constant 2 : index
    %c0_28 = arith.constant 0 : index
    %c0_29 = arith.constant 0 : index
    %24 = vector.load %arg4[%c0_26, %c2_27, %c0_28, %c0_29] : memref<1x3x8x128xf32, #tpu.memory_space<vmem>>, vector<1x1x8x128xf32>
    %25 = vector.shape_cast %24 : vector<1x1x8x128xf32> to vector<8x128xf32>
    %26 = vector.shape_cast %23 : vector<8x128xf32> to vector<1x1x8x128xf32>
    tpu.vector_store %arg4[%c0_26, %c2_27, %c0_28, %c0_29], %26 {strides = array<i32>} : memref<1x3x8x128xf32, #tpu.memory_space<vmem>>, vector<1x1x8x128xf32>,
    return
  }
  func.func @transform_0(%arg0: i32, %arg1: i32) -> (i32, i32, i32) {
    %c1_i32 = arith.constant 1 : i32
    %0 = arith.muli %arg0, %c1_i32 : i32
    %1 = arith.addi %0, %arg1 : i32
    %c0_i32 = arith.constant 0 : i32
    %2 = arith.minsi %1, %c0_i32 : i32
    %c0_i32_0 = arith.constant 0 : i32
    %c0_i32_1 = arith.constant 0 : i32
    %c0_i32_2 = arith.constant 0 : i32
    return %2, %c0_i32_0, %c0_i32_1 : i32, i32, i32
  }
  func.func @transform_1(%arg0: i32, %arg1: i32) -> (i32, i32, i32) {
    %c1_i32 = arith.constant 1 : i32
    %0 = arith.muli %arg0, %c1_i32 : i32
    %1 = arith.addi %0, %arg1 : i32
    %c0_i32 = arith.constant 0 : i32
    %2 = arith.minsi %1, %c0_i32 : i32
    %c0_i32_0 = arith.constant 0 : i32
    %c0_i32_1 = arith.constant 0 : i32
    %c0_i32_2 = arith.constant 0 : i32
    return %2, %c0_i32_0, %c0_i32_1 : i32, i32, i32
  }
  func.func @transform_2(%arg0: i32, %arg1: i32) -> (i32, i32, i32, i32) {
    %c0_i32 = arith.constant 0 : i32
    %c0_i32_0 = arith.constant 0 : i32
    %c0_i32_1 = arith.constant 0 : i32
    %c0_i32_2 = arith.constant 0 : i32
    return %arg0, %c0_i32, %c0_i32_0, %c0_i32_1 : i32, i32, i32, i32
  }
}

</mosaic_0001>

<bundles_post_ra>
// kernel: _tversky_loss_impl.1
= control target key start
LH: loop header
LB: loop body
LE: loop exit
PB: predicated region body
PF: predicated region fallthrough
CT: control target
= control target key end

     0   :  { %s159_s0 = inlined_call_operand.vmem [shape: f32[2,8,128], index: 0, kind: input, shape index: {}]   ;;  %s160_s1 = inlined_call_operand.vmem [shape: f32[2,8,128], index: 1, kind: input, shape index: {}]   ;;  %s161_s2 = inlined_call_operand.vmem [shape: f32[1,3,8,128], index: 2, kind: output, shape index: {}]  }
   0x1   :  { %v82_v0 = vld [vmem:[%s159_s0] sm:$0xff]  ;;  %v83_v1 = vld [vmem:[%s159_s0 + $0x8] sm:$0xff] }
   0x2   :  { %v84_v2 = vld [vmem:[%s160_s1] sm:$0xff]  ;;  %v85_v3 = vld [vmem:[%s160_s1 + $0x8] sm:$0xff]  ;;  %v94_v5 = vadd.f32 %v83_v1, %v82_v0 }
   0x3   :  { %v87_v4 = vmul.f32 %v84_v2, %v82_v0  ;;  %v88_v6 = vmul.f32 %v85_v3, %v83_v1  ;;  %v99_v7 = vadd.f32 %v85_v3, %v84_v2 }
   0x4   :  { %119 = vst [vmem:[%s161_s2 + $0x8] sm:$0xff] %v94_v5 }
   0x5   :  { %v89_v8 = vadd.f32 %v88_v6, %v87_v4  ;;  %121 = vst [vmem:[%s161_s2 + $0x10] sm:$0xff] %v99_v7 }
   0x7   :  { %91 = vst [vmem:[%s161_s2] sm:$0xff] %v89_v8 }

</bundles_post_ra>
